<compile_context>
chip_gen: v6e
topology: v6e:2x2x1
jax: 0.10.0
libtpu: 0.0.40
codegen_flags: <defaults>
</compile_context>

<pallas_src>
import functools

import jax
import jax.numpy as jnp
from jax.experimental import pallas as pl
from jax.experimental.pallas import tpu as pltpu


def _round_up(x, m):
    return (x + m - 1) // m * m


def _choose_tiling(n, n_img, max_tile=8192, base=512):
    """Pad the anchor count and pick the lane tile (multiple of 128)."""
    n_pad = _round_up(max(n, 1), base)
    if n_pad <= max_tile:
        tile = n_pad                    # one block covers the whole padded image
    else:
        n_pad = _round_up(n, max_tile)
        tile = max_tile
    # Guarantee at least 2 total grid steps so a 2-TC chip (v7x) gets both cores
    # busy; on 1-TC chips this only costs one extra (~0.35us) pipeline step.
    if n_img * (n_pad // tile) < 2 and tile % 256 == 0:
        tile //= 2
    return n_pad, tile


# ---------------------------------------------------------------------------
# Kernel 1: teacher joint confidence (max over classes), lane-dense output
# ---------------------------------------------------------------------------
def _teacher_mv_kernel(t_cls_ref, t_cent_ref, mv_ref, *, l1, lane_tile):
    j = pl.program_id(1)
    logits = t_cls_ref[0]                                    # (C, T) f32
    # sigmoid is monotone: max_c sigmoid(x_c) == sigmoid(max_c x_c), so reduce
    # the raw logits (cheap sublane max) and do only 2 sigmoids per anchor.
    max_logit = jnp.max(logits, axis=0, keepdims=True)       # (1, T)
    cent = jax.nn.sigmoid(t_cent_ref[0])                     # (1, T)
    col = jax.lax.broadcasted_iota(jnp.int32, max_logit.shape, 1) + j * lane_tile
    scale = jnp.where(col < l1, cent, 1.0)                   # p3/p4 rows use centerness
    mv_ref[0] = jax.nn.sigmoid(max_logit) * scale            # (1, T), lane-dense store


def teacher_max_vals(t_cls_t, t_cent_t, *, l1, lane_tile):
    n_img, c, n_pad = t_cls_t.shape
    kern = functools.partial(_teacher_mv_kernel, l1=l1, lane_tile=lane_tile)
    return pl.pallas_call(
        kern,
        out_shape=jax.ShapeDtypeStruct((n_img, 1, n_pad), jnp.float32),
        grid=(n_img, n_pad // lane_tile),
        in_specs=[
            pl.BlockSpec((1, c, lane_tile), lambda i, j: (i, 0, j)),
            pl.BlockSpec((1, 1, lane_tile), lambda i, j: (i, 0, j)),
        ],
        out_specs=pl.BlockSpec((1, 1, lane_tile), lambda i, j: (i, 0, j)),
        compiler_params=pltpu.CompilerParams(
            dimension_semantics=("parallel", "parallel")),
    )(t_cls_t, t_cent_t)


# ---------------------------------------------------------------------------
# Kernel 2: QFLv2 + SmoothL1 + centerness-BCE lane-partials, one launch for
#           all images.  Only sublane reductions per step; one packed (3, T)
#           lane-dense partial-output row per grid step.
# ---------------------------------------------------------------------------
def _loss_kernel(s_cls_ref, t_cls_ref, w_ref, aux_ref, part_ref):
    x = s_cls_ref[0]                                         # (C, T) student logits
    pred = jax.nn.sigmoid(x)                                 # (C, T)
    teach = jax.nn.sigmoid(t_cls_ref[0])                     # (C, T)
    w = w_ref[0]                                             # (1, T), broadcasts over C
    pos = w > 0.0
    valid = w >= 0.0                                         # padded anchors carry w = -1

    # F.binary_cross_entropy clamps log terms at -100.  Use the identity
    # log(1 - sigmoid(x)) = log(sigmoid(x)) - x: one EUP log instead of two,
    # with the -100 clamp applied to the recomposed value for PyTorch parity.
    log_p_raw = jnp.log(pred)
    log_p = jnp.maximum(log_p_raw, -100.0)
    log_1mp = jnp.maximum(log_p_raw - x, -100.0)

    # Unified QFLv2: target = teacher prob on positive anchors, 0 elsewhere.
    #   pos  : BCE(pred, teach) * (teach - pred)^2
    #   !pos : BCE(pred, 0)     * pred^2
    target = jnp.where(pos, teach, 0.0)
    bce = -(target * log_p + (1.0 - target) * log_1mp)
    dt = target - pred
    qfl_row = jnp.sum(jnp.where(valid, bce * dt * dt, 0.0),
                      axis=0, keepdims=True)                 # (1, T)

    a = aux_ref[0]                                           # (8, T) packed aux slab
    d = a[0:5, :]                                            # s_bbox - t_bbox
    wm = a[7:8, :]                                           # weight_mask (0 on pads)
    b = wm > 0.0

    ad = jnp.abs(d)
    sl1 = jnp.where(ad < 1.0, 0.5 * d * d, ad - 0.5)         # SmoothL1, beta = 1
    bbox_row = jnp.sum(jnp.where(b, sl1 * wm, 0.0),
                       axis=0, keepdims=True)                # (1, T)

    cent_logits = a[5:7, :]                                  # rows: (s_cent, t_cent)
    cent_sig = jax.nn.sigmoid(cent_logits)                   # fused (2, T) sigmoid
    sc = cent_sig[0:1, :]
    tc = cent_sig[1:2, :]
    lsc_raw = jnp.log(sc)
    lsc = jnp.maximum(lsc_raw, -100.0)
    l1msc = jnp.maximum(lsc_raw - cent_logits[0:1, :], -100.0)
    bce_c = -(tc * lsc + (1.0 - tc) * l1msc)
    cent_row = jnp.where(b, bce_c * wm, 0.0)                 # (1, T)

    part_ref[0] = jnp.concatenate([qfl_row, bbox_row, cent_row], axis=0)  # (3, T)


def loss_partials(s_cls_t, t_cls_t, w_t, aux_t, *, lane_tile):
    n_img, c, n_pad = s_cls_t.shape
    cls_spec = pl.BlockSpec((1, c, lane_tile), lambda i, j: (i, 0, j))
    row_spec = pl.BlockSpec((1, 1, lane_tile), lambda i, j: (i, 0, j))
    aux_spec = pl.BlockSpec((1, 8, lane_tile), lambda i, j: (i, 0, j))
    out_spec = pl.BlockSpec((1, 3, lane_tile), lambda i, j: (i, 0, j))
    return pl.pallas_call(
        _loss_kernel,
        out_shape=jax.ShapeDtypeStruct((n_img, 3, n_pad), jnp.float32),
        grid=(n_img, n_pad // lane_tile),
        in_specs=[cls_spec, cls_spec, row_spec, aux_spec],
        out_specs=out_spec,
        compiler_params=pltpu.CompilerParams(
            dimension_semantics=("parallel", "parallel")),
    )(s_cls_t, t_cls_t, w_t, aux_t)


# ---------------------------------------------------------------------------
# Plain-JAX glue: batched top-k mask + batched loss assembly
# ---------------------------------------------------------------------------
def _topk_mask(vals, k):
    """Boolean mask of the per-row top-k entries of vals, shape (I, M)."""
    n_img, m = vals.shape
    if m == 0:
        return jnp.zeros((n_img, 0), dtype=bool)
    kk = min(k, m)
    if kk >= m:
        return jnp.ones((n_img, m), dtype=bool)
    # kth-value threshold instead of a 2-D boolean scatter (much cheaper on TPU).
    # TODO(synk): ties at the kth value admit >k anchors, unlike torch.topk's
    # exactly-k selection.
    kth = jax.lax.top_k(vals, kk)[0][:, kk - 1:kk]           # (I, 1)
    return vals >= kth


@functools.partial(jax.jit, static_argnames=("l0", "l1", "thres", "max_tile"))
def _mcl_loss_batched(t_cls, t_bbox, t_cent, s_cls, s_bbox, s_cent,
                      *, l0, l1, thres, max_tile):
    n_img, n, _ = t_cls.shape
    nb = s_bbox.shape[2]
    n_pad, tile = _choose_tiling(n, n_img, max_tile=max_tile)
    pad_n = n_pad - n

    pad_rows = lambda x: jnp.pad(x, ((0, 0), (0, pad_n), (0, 0)))
    to_lane_dense = lambda x: jnp.transpose(pad_rows(x), (0, 2, 1))

    t_cls_t = to_lane_dense(t_cls)                           # (I, C, NP), used by both kernels
    t_cent_t = to_lane_dense(t_cent)                         # (I, 1, NP), reused for aux slab

    # --- Pallas kernel 1: teacher joint confidence per anchor -------------
    mv_full = teacher_max_vals(t_cls_t, t_cent_t, l1=l1, lane_tile=tile)
    mv = jax.lax.stop_gradient(mv_full[:, 0, :n])            # (I, N)

    # --- coarse top-2000-per-level + fine threshold, intersection ---------
    # TODO(synk): torch.topk + torch.unique(return_counts=True) intersection has
    # no Pallas equivalent; reproduced as a boolean set intersection in plain JAX.
    coarse = jnp.concatenate([
        _topk_mask(mv[:, :l0], 2000),
        _topk_mask(mv[:, l0:l1], 2000),
        jnp.ones((n_img, n - l1), dtype=bool),
    ], axis=1)
    fine = mv > thres
    weight_mask = jnp.where(coarse & fine, mv, 0.0)          # (I, N)
    n_pos = jnp.sum((weight_mask > 0.0).astype(jnp.float32), axis=1)   # (I,)
    has_pos = n_pos > 0.0

    # effective QFL weight: weight_mask if positives exist, else max_vals
    w_eff = jnp.where(has_pos[:, None], weight_mask, mv)     # (I, N)
    w_sum = jnp.sum(w_eff, axis=1)

    # --- pack kernel-2 operands directly in lane-dense form ---------------
    s_cls_t = to_lane_dense(s_cls)                           # (I, C, NP)
    w_t = jnp.pad(w_eff, ((0, 0), (0, pad_n)),
                  constant_values=-1.0)[:, None, :]          # (I, 1, NP)
    diff_t = to_lane_dense(s_bbox - t_bbox)                  # (I, 5, NP)
    s_cent_t = to_lane_dense(s_cent)                         # (I, 1, NP)
    wm_t = jnp.pad(weight_mask, ((0, 0), (0, pad_n)))[:, None, :]      # (I, 1, NP)
    aux_t = jnp.concatenate([diff_t, s_cent_t, t_cent_t, wm_t], axis=1)  # (I, 8, NP)

    # --- Pallas kernel 2: all loss partial rows in one launch -------------
    part = loss_partials(s_cls_t, t_cls_t, w_t, aux_t, lane_tile=tile)  # (I, 3, NP)
    sums = jnp.sum(part, axis=2)                             # (I, 3)
    qfl_sum, bbox_sum, cent_sum = sums[:, 0], sums[:, 1], sums[:, 2]

    # Intentional deviation: PyTorch divides by sum(w) unguarded; the eps guard
    # only matters in the degenerate all-zero-weight case.
    loss_cls = qfl_sum / jnp.maximum(w_sum, 1e-12)
    loss_bbox = jnp.where(has_pos,
                          bbox_sum / jnp.maximum(n_pos * nb, 1.0) * 10.0, 0.0)
    loss_cent = jnp.where(has_pos,
                          cent_sum / jnp.maximum(n_pos, 1.0) * 10.0, 0.0)
    return dict(loss_cls=jnp.mean(loss_cls),
                loss_bbox=jnp.mean(loss_bbox),
                loss_centerness=jnp.mean(loss_cent))


class RotatedMCLLossV2:
    """JAX/Pallas forward-pass equivalent of the PyTorch RotatedMCLLossV2."""

    def __init__(self, cls_channels=16, thres=0.02, max_tile=8192):
        self.cls_channels = cls_channels
        self.thres = float(thres)
        self.max_tile = int(max_tile)

    def __call__(self, img_t_logits_list, img_s_logits_list, featmap_sizes,
                 img_metas=None):
        level_inds = []
        start = 0
        for size in featmap_sizes:
            # mirrors the PyTorch reference (uses size[0] * size[0])
            start = start + size[0] * size[0]
            level_inds.append(start)
        l0, l1 = level_inds[:2]

        stack = lambda lst, k: jnp.stack(
            [jnp.asarray(x[k], jnp.float32) for x in lst], axis=0)
        t_cls, t_bbox, t_cent = (stack(img_t_logits_list, k) for k in range(3))
        s_cls, s_bbox, s_cent = (stack(img_s_logits_list, k) for k in range(3))

        return _mcl_loss_batched(t_cls, t_bbox, t_cent, s_cls, s_bbox, s_cent,
                                 l0=int(l0), l1=int(l1), thres=self.thres,
                                 max_tile=self.max_tile)


# ---------------------------------------------------------------------------
# Pure-JAX reference (direct translation of the PyTorch module) for validation
# ---------------------------------------------------------------------------
def _reference_forward(img_t_list, img_s_list, featmap_sizes, thres):
    level_inds = []
    start = 0
    for size in featmap_sizes:
        start += size[0] * size[0]
        level_inds.append(start)
    l0, l1 = level_inds[:2]
    lcls, lbox, lcen = [], [], []
    for t_logits, s_logits in zip(img_t_list, img_s_list):
        t_cls, t_bbox, t_cent = [jnp.asarray(x, jnp.float32) for x in t_logits]
        s_cls, s_bbox, s_cent = [jnp.asarray(x, jnp.float32) for x in s_logits]
        n = t_cls.shape[0]
        probs = jax.nn.sigmoid(t_cls)
        cent = jax.nn.sigmoid(t_cent)
        joint = jnp.concatenate([probs[:l1] * cent[:l1], probs[l1:]], axis=0)
        mv = jnp.max(joint, axis=1)
        coarse = jnp.concatenate([
            _topk_mask(mv[None, :l0], 2000)[0],
            _topk_mask(mv[None, l0:l1], 2000)[0],
            jnp.ones((n - l1,), dtype=bool)])
        wm = jnp.where(coarse & (mv > thres), mv, 0.0)
        has_pos = jnp.sum(wm > 0) > 0
        w = jnp.where(has_pos, wm, mv)
        pred = jax.nn.sigmoid(s_cls)
        logp = jnp.maximum(jnp.log(pred), -100.0)
        log1mp = jnp.maximum(jnp.log(1.0 - pred), -100.0)
        loss_neg = -log1mp * pred * pred
        bce_t = -(probs * logp + (1.0 - probs) * log1mp)
        loss_pos = bce_t * (probs - pred) ** 2
        qfl = jnp.where((w > 0)[:, None], loss_pos, loss_neg)
        loss_cls = jnp.sum(qfl) / jnp.sum(w)
        b = (wm > 0)[:, None]
        npos = jnp.sum(wm > 0).astype(jnp.float32)
        d = s_bbox - t_bbox
        ad = jnp.abs(d)
        sl1 = jnp.where(ad < 1.0, 0.5 * d * d, ad - 0.5)
        lb = jnp.sum(jnp.where(b, sl1 * wm[:, None], 0.0)) / jnp.maximum(npos * 5.0, 1.0) * 10.0
        scs = jax.nn.sigmoid(s_cent)
        bce_c = -(cent * jnp.maximum(jnp.log(scs), -100.0)
                  + (1.0 - cent) * jnp.maximum(jnp.log(1.0 - scs), -100.0))
        lc = jnp.sum(jnp.where(b, bce_c * wm[:, None], 0.0)) / jnp.maximum(npos, 1.0) * 10.0
        lcls.append(loss_cls)
        lbox.append(jnp.where(has_pos, lb, 0.0))
        lcen.append(jnp.where(has_pos, lc, 0.0))
    m = len(lcls)
    return dict(loss_cls=sum(lcls) / m, loss_bbox=sum(lbox) / m,
                loss_centerness=sum(lcen) / m)


if __name__ == "__main__":
    key = jax.random.PRNGKey(0)
    featmap_sizes = [(16, 16), (8, 8), (4, 4)]     # 256 + 64 + 16 = 336 anchor points
    N = sum(s[0] * s[0] for s in featmap_sizes)
    C = 16
    NUM_IMGS = 2

    keys = jax.random.split(key, NUM_IMGS * 6)
    mk = lambda k, shape: jax.random.normal(k, shape, dtype=jnp.float32)

    img_t_logits_list, img_s_logits_list = [], []
    ki = 0
    for _ in range(NUM_IMGS):
        img_t_logits_list.append([mk(keys[ki + 0], (N, C)),
                                  mk(keys[ki + 1], (N, 5)),
                                  mk(keys[ki + 2], (N, 1))])
        img_s_logits_list.append([mk(keys[ki + 3], (N, C)),
                                  mk(keys[ki + 4], (N, 5)),
                                  mk(keys[ki + 5], (N, 1))])
        ki += 6

    loss_mod = RotatedMCLLossV2(cls_channels=C, thres=0.02)
    out = loss_mod(img_t_logits_list, img_s_logits_list, featmap_sizes)
    out = jax.block_until_ready(out)

    ref = _reference_forward(img_t_logits_list, img_s_logits_list,
                             featmap_sizes, thres=0.02)
    for name in ("loss_cls", "loss_bbox", "loss_centerness"):
        a, b = float(out[name]), float(ref[name])
        assert abs(a - b) <= 2e-3 * max(1.0, abs(b)), (name, a, b)

    print("KERNEL_OK")
</pallas_src>

<mosaic_0001>
module attributes {stable_mosaic.version = 11 : i64} {
  func.func @_teacher_mv_kernel(%arg0: i32, %arg1: i32, %arg2: memref<1x16x512xf32, #tpu.memory_space<vmem>>, %arg3: memref<1x1x512xf32, #tpu.memory_space<vmem>>, %arg4: memref<1x1x512xf32, #tpu.memory_space<vmem>>) attributes {dimension_semantics = [#tpu.dimension_semantics<parallel>, #tpu.dimension_semantics<parallel>], iteration_bounds = array<i64: 2, 1>, scalar_prefetch = 0 : i64, scratch_operands = 0 : i64, tpu.core_type = #tpu.core_type<tc>, window_params = [{transform_indices = @transform_0, window_bounds = array<i64: 1, 16, 512>}, {transform_indices = @transform_1, window_bounds = array<i64: 1, 1, 512>}, {transform_indices = @transform_2, window_bounds = array<i64: 1, 1, 512>}]} {
    %c0 = arith.constant 0 : index
    %c0_0 = arith.constant 0 : index
    %c0_1 = arith.constant 0 : index
    %0 = vector.load %arg2[%c0, %c0_0, %c0_1] : memref<1x16x512xf32, #tpu.memory_space<vmem>>, vector<1x16x512xf32>
    %1 = vector.shape_cast %0 : vector<1x16x512xf32> to vector<16x512xf32>
    %cst = arith.constant dense<0xFF800000> : vector<512xf32>
    %2 = vector.multi_reduction <maximumf>, %1, %cst [0] : vector<16x512xf32> to vector<512xf32>
    %3 = vector.shape_cast %2 : vector<512xf32> to vector<1x512xf32>
    %c0_2 = arith.constant 0 : index
    %c0_3 = arith.constant 0 : index
    %c0_4 = arith.constant 0 : index
    %4 = vector.load %arg3[%c0_2, %c0_3, %c0_4] : memref<1x1x512xf32, #tpu.memory_space<vmem>>, vector<1x1x512xf32>
    %5 = vector.shape_cast %4 : vector<1x1x512xf32> to vector<1x512xf32>
    %6 = arith.negf %5 : vector<1x512xf32>
    %7 = math.exp %6 : vector<1x512xf32>
    %cst_5 = arith.constant 1.000000e+00 : f32
    %8 = vector.broadcast %cst_5 : f32 to vector<1x512xf32>
    %9 = arith.addf %8, %7 : vector<1x512xf32>
    %10 = arith.divf %8, %9 : vector<1x512xf32>
    %11 = tpu.iota {dimensions = array<i32: 1>} : vector<1x512xi32>
    %c512_i32 = arith.constant 512 : i32
    %12 = arith.muli %arg1, %c512_i32 : i32
    %13 = vector.broadcast %12 : i32 to vector<1x512xi32>
    %14 = arith.addi %11, %13 : vector<1x512xi32>
    %c320_i32 = arith.constant 320 : i32
    %15 = vector.broadcast %c320_i32 : i32 to vector<1x512xi32>
    %16 = arith.cmpi slt, %14, %15 : vector<1x512xi32>
    %cst_6 = arith.constant 1.000000e+00 : f32
    %17 = vector.broadcast %cst_6 : f32 to vector<1x512xf32>
    %18 = arith.select %16, %10, %17 : vector<1x512xi1>, vector<1x512xf32>
    %19 = arith.negf %3 : vector<1x512xf32>
    %20 = math.exp %19 : vector<1x512xf32>
    %cst_7 = arith.constant 1.000000e+00 : f32
    %21 = vector.broadcast %cst_7 : f32 to vector<1x512xf32>
    %22 = arith.addf %21, %20 : vector<1x512xf32>
    %23 = arith.divf %21, %22 : vector<1x512xf32>
    %24 = arith.mulf %23, %18 : vector<1x512xf32>
    %c0_8 = arith.constant 0 : index
    %c0_9 = arith.constant 0 : index
    %c0_10 = arith.constant 0 : index
    %25 = vector.load %arg4[%c0_8, %c0_9, %c0_10] : memref<1x1x512xf32, #tpu.memory_space<vmem>>, vector<1x1x512xf32>
    %26 = vector.shape_cast %25 : vector<1x1x512xf32> to vector<1x512xf32>
    %27 = vector.shape_cast %24 : vector<1x512xf32> to vector<1x1x512xf32>
    tpu.vector_store %arg4[%c0_8, %c0_9, %c0_10], %27 {strides = array<i32>} : memref<1x1x512xf32, #tpu.memory_space<vmem>>, vector<1x1x512xf32>,
    return
  }
  func.func @transform_0(%arg0: i32, %arg1: i32) -> (i32, i32, i32) {
    %c0_i32 = arith.constant 0 : i32
    %c0_i32_0 = arith.constant 0 : i32
    return %arg0, %c0_i32, %arg1 : i32, i32, i32
  }
  func.func @transform_1(%arg0: i32, %arg1: i32) -> (i32, i32, i32) {
    %c0_i32 = arith.constant 0 : i32
    %c0_i32_0 = arith.constant 0 : i32
    return %arg0, %c0_i32, %arg1 : i32, i32, i32
  }
  func.func @transform_2(%arg0: i32, %arg1: i32) -> (i32, i32, i32) {
    %c0_i32 = arith.constant 0 : i32
    %c0_i32_0 = arith.constant 0 : i32
    return %arg0, %c0_i32, %arg1 : i32, i32, i32
  }
}

module attributes {stable_mosaic.version = 11 : i64} {
  func.func @_loss_kernel(%arg0: i32, %arg1: i32, %arg2: memref<1x16x512xf32, #tpu.memory_space<vmem>>, %arg3: memref<1x16x512xf32, #tpu.memory_space<vmem>>, %arg4: memref<1x1x512xf32, #tpu.memory_space<vmem>>, %arg5: memref<1x8x512xf32, #tpu.memory_space<vmem>>, %arg6: memref<1x3x512xf32, #tpu.memory_space<vmem>>) attributes {dimension_semantics = [#tpu.dimension_semantics<parallel>, #tpu.dimension_semantics<parallel>], iteration_bounds = array<i64: 2, 1>, scalar_prefetch = 0 : i64, scratch_operands = 0 : i64, tpu.core_type = #tpu.core_type<tc>, window_params = [{transform_indices = @transform_0, window_bounds = array<i64: 1, 16, 512>}, {transform_indices = @transform_1, window_bounds = array<i64: 1, 16, 512>}, {transform_indices = @transform_2, window_bounds = array<i64: 1, 1, 512>}, {transform_indices = @transform_3, window_bounds = array<i64: 1, 8, 512>}, {transform_indices = @transform_4, window_bounds = array<i64: 1, 3, 512>}]} {
    %c0 = arith.constant 0 : index
    %c0_0 = arith.constant 0 : index
    %c0_1 = arith.constant 0 : index
    %0 = vector.load %arg2[%c0, %c0_0, %c0_1] : memref<1x16x512xf32, #tpu.memory_space<vmem>>, vector<1x16x512xf32>
    %1 = vector.shape_cast %0 : vector<1x16x512xf32> to vector<16x512xf32>
    %2 = arith.negf %1 : vector<16x512xf32>
    %3 = math.exp %2 : vector<16x512xf32>
    %cst = arith.constant 1.000000e+00 : f32
    %4 = vector.broadcast %cst : f32 to vector<16x512xf32>
    %5 = arith.addf %4, %3 : vector<16x512xf32>
    %6 = arith.divf %4, %5 : vector<16x512xf32>
    %c0_2 = arith.constant 0 : index
    %c0_3 = arith.constant 0 : index
    %c0_4 = arith.constant 0 : index
    %7 = vector.load %arg3[%c0_2, %c0_3, %c0_4] : memref<1x16x512xf32, #tpu.memory_space<vmem>>, vector<1x16x512xf32>
    %8 = vector.shape_cast %7 : vector<1x16x512xf32> to vector<16x512xf32>
    %9 = arith.negf %8 : vector<16x512xf32>
    %10 = math.exp %9 : vector<16x512xf32>
    %cst_5 = arith.constant 1.000000e+00 : f32
    %11 = vector.broadcast %cst_5 : f32 to vector<16x512xf32>
    %12 = arith.addf %11, %10 : vector<16x512xf32>
    %13 = arith.divf %11, %12 : vector<16x512xf32>
    %c0_6 = arith.constant 0 : index
    %c0_7 = arith.constant 0 : index
    %c0_8 = arith.constant 0 : index
    %14 = vector.load %arg4[%c0_6, %c0_7, %c0_8] : memref<1x1x512xf32, #tpu.memory_space<vmem>>, vector<1x1x512xf32>
    %15 = vector.shape_cast %14 : vector<1x1x512xf32> to vector<1x512xf32>
    %cst_9 = arith.constant 0.000000e+00 : f32
    %16 = vector.broadcast %cst_9 : f32 to vector<1x512xf32>
    %17 = arith.cmpf ogt, %15, %16 : vector<1x512xf32>
    %cst_10 = arith.constant 0.000000e+00 : f32
    %18 = vector.broadcast %cst_10 : f32 to vector<1x512xf32>
    %19 = arith.cmpf oge, %15, %18 : vector<1x512xf32>
    %20 = math.log %6 : vector<16x512xf32>
    %cst_11 = arith.constant -1.000000e+02 : f32
    %21 = vector.broadcast %cst_11 : f32 to vector<16x512xf32>
    %22 = arith.maximumf %20, %21 : vector<16x512xf32>
    %23 = arith.subf %20, %1 : vector<16x512xf32>
    %cst_12 = arith.constant -1.000000e+02 : f32
    %24 = vector.broadcast %cst_12 : f32 to vector<16x512xf32>
    %25 = arith.maximumf %23, %24 : vector<16x512xf32>
    %cst_13 = arith.constant 0.000000e+00 : f32
    %26 = vector.shape_cast %17 : vector<1x512xi1> to vector<1x512xi1>
    %27 = vector.broadcast %26 : vector<1x512xi1> to vector<16x512xi1>
    %28 = vector.broadcast %cst_13 : f32 to vector<16x512xf32>
    %29 = arith.select %27, %13, %28 : vector<16x512xi1>, vector<16x512xf32>
    %30 = arith.mulf %29, %22 : vector<16x512xf32>
    %cst_14 = arith.constant 1.000000e+00 : f32
    %31 = vector.broadcast %cst_14 : f32 to vector<16x512xf32>
    %32 = arith.subf %31, %29 : vector<16x512xf32>
    %33 = arith.mulf %32, %25 : vector<16x512xf32>
    %34 = arith.addf %30, %33 : vector<16x512xf32>
    %cst_15 = arith.constant 0.000000e+00 : f32
    %35 = vector.broadcast %cst_15 : f32 to vector<16x512xf32>
    %36 = arith.subf %35, %34 : vector<16x512xf32>
    %37 = arith.subf %29, %6 : vector<16x512xf32>
    %38 = arith.mulf %36, %37 : vector<16x512xf32>
    %39 = arith.mulf %38, %37 : vector<16x512xf32>
    %cst_16 = arith.constant 0.000000e+00 : f32
    %40 = vector.shape_cast %19 : vector<1x512xi1> to vector<1x512xi1>
    %41 = vector.broadcast %40 : vector<1x512xi1> to vector<16x512xi1>
    %42 = vector.broadcast %cst_16 : f32 to vector<16x512xf32>
    %43 = arith.select %41, %39, %42 : vector<16x512xi1>, vector<16x512xf32>
    %cst_17 = arith.constant dense<0.000000e+00> : vector<512xf32>
    %44 = vector.multi_reduction <add>, %43, %cst_17 [0] : vector<16x512xf32> to vector<512xf32>
    %45 = vector.shape_cast %44 : vector<512xf32> to vector<1x512xf32>
    %c0_18 = arith.constant 0 : index
    %c0_19 = arith.constant 0 : index
    %c0_20 = arith.constant 0 : index
    %46 = vector.load %arg5[%c0_18, %c0_19, %c0_20] : memref<1x8x512xf32, #tpu.memory_space<vmem>>, vector<1x8x512xf32>
    %47 = vector.shape_cast %46 : vector<1x8x512xf32> to vector<8x512xf32>
    %48 = vector.extract_strided_slice %47 {offsets = [0, 0], sizes = [5, 512], strides = [1, 1]} : vector<8x512xf32> to vector<5x512xf32>
    %49 = vector.extract_strided_slice %47 {offsets = [7, 0], sizes = [1, 512], strides = [1, 1]} : vector<8x512xf32> to vector<1x512xf32>
    %cst_21 = arith.constant 0.000000e+00 : f32
    %50 = vector.broadcast %cst_21 : f32 to vector<1x512xf32>
    %51 = arith.cmpf ogt, %49, %50 : vector<1x512xf32>
    %52 = math.absf %48 : vector<5x512xf32>
    %cst_22 = arith.constant 1.000000e+00 : f32
    %53 = vector.broadcast %cst_22 : f32 to vector<5x512xf32>
    %54 = arith.cmpf olt, %52, %53 : vector<5x512xf32>
    %cst_23 = arith.constant 5.000000e-01 : f32
    %55 = vector.broadcast %cst_23 : f32 to vector<5x512xf32>
    %56 = arith.mulf %55, %48 : vector<5x512xf32>
    %57 = arith.mulf %56, %48 : vector<5x512xf32>
    %cst_24 = arith.constant 5.000000e-01 : f32
    %58 = vector.broadcast %cst_24 : f32 to vector<5x512xf32>
    %59 = arith.subf %52, %58 : vector<5x512xf32>
    %60 = arith.select %54, %57, %59 : vector<5x512xi1>, vector<5x512xf32>
    %61 = vector.broadcast %49 : vector<1x512xf32> to vector<5x512xf32>
    %62 = arith.mulf %60, %61 : vector<5x512xf32>
    %cst_25 = arith.constant 0.000000e+00 : f32
    %63 = vector.shape_cast %51 : vector<1x512xi1> to vector<1x512xi1>
    %64 = vector.broadcast %63 : vector<1x512xi1> to vector<5x512xi1>
    %65 = vector.broadcast %cst_25 : f32 to vector<5x512xf32>
    %66 = arith.select %64, %62, %65 : vector<5x512xi1>, vector<5x512xf32>
    %cst_26 = arith.constant dense<0.000000e+00> : vector<512xf32>
    %67 = vector.multi_reduction <add>, %66, %cst_26 [0] : vector<5x512xf32> to vector<512xf32>
    %68 = vector.shape_cast %67 : vector<512xf32> to vector<1x512xf32>
    %69 = vector.extract_strided_slice %47 {offsets = [5, 0], sizes = [2, 512], strides = [1, 1]} : vector<8x512xf32> to vector<2x512xf32>
    %70 = arith.negf %69 : vector<2x512xf32>
    %71 = math.exp %70 : vector<2x512xf32>
    %cst_27 = arith.constant 1.000000e+00 : f32
    %72 = vector.broadcast %cst_27 : f32 to vector<2x512xf32>
    %73 = arith.addf %72, %71 : vector<2x512xf32>
    %74 = arith.divf %72, %73 : vector<2x512xf32>
    %75 = vector.extract_strided_slice %74 {offsets = [0, 0], sizes = [1, 512], strides = [1, 1]} : vector<2x512xf32> to vector<1x512xf32>
    %76 = vector.extract_strided_slice %74 {offsets = [1, 0], sizes = [1, 512], strides = [1, 1]} : vector<2x512xf32> to vector<1x512xf32>
    %77 = math.log %75 : vector<1x512xf32>
    %cst_28 = arith.constant -1.000000e+02 : f32
    %78 = vector.broadcast %cst_28 : f32 to vector<1x512xf32>
    %79 = arith.maximumf %77, %78 : vector<1x512xf32>
    %80 = vector.extract_strided_slice %69 {offsets = [0, 0], sizes = [1, 512], strides = [1, 1]} : vector<2x512xf32> to vector<1x512xf32>
    %81 = arith.subf %77, %80 : vector<1x512xf32>
    %cst_29 = arith.constant -1.000000e+02 : f32
    %82 = vector.broadcast %cst_29 : f32 to vector<1x512xf32>
    %83 = arith.maximumf %81, %82 : vector<1x512xf32>
    %84 = arith.mulf %76, %79 : vector<1x512xf32>
    %cst_30 = arith.constant 1.000000e+00 : f32
    %85 = vector.broadcast %cst_30 : f32 to vector<1x512xf32>
    %86 = arith.subf %85, %76 : vector<1x512xf32>
    %87 = arith.mulf %86, %83 : vector<1x512xf32>
    %88 = arith.addf %84, %87 : vector<1x512xf32>
    %cst_31 = arith.constant 0.000000e+00 : f32
    %89 = vector.broadcast %cst_31 : f32 to vector<1x512xf32>
    %90 = arith.subf %89, %88 : vector<1x512xf32>
    %91 = arith.mulf %90, %49 : vector<1x512xf32>
    %cst_32 = arith.constant 0.000000e+00 : f32
    %92 = vector.broadcast %cst_32 : f32 to vector<1x512xf32>
    %93 = arith.select %51, %91, %92 : vector<1x512xi1>, vector<1x512xf32>
    %94 = tpu.concatenate %45, %68, %93 in 0 : vector<1x512xf32>, vector<1x512xf32>, vector<1x512xf32> -> vector<3x512xf32>
    %c0_33 = arith.constant 0 : index
    %c0_34 = arith.constant 0 : index
    %c0_35 = arith.constant 0 : index
    %95 = vector.load %arg6[%c0_33, %c0_34, %c0_35] : memref<1x3x512xf32, #tpu.memory_space<vmem>>, vector<1x3x512xf32>
    %96 = vector.shape_cast %95 : vector<1x3x512xf32> to vector<3x512xf32>
    %97 = vector.shape_cast %94 : vector<3x512xf32> to vector<1x3x512xf32>
    tpu.vector_store %arg6[%c0_33, %c0_34, %c0_35], %97 {strides = array<i32>} : memref<1x3x512xf32, #tpu.memory_space<vmem>>, vector<1x3x512xf32>,
    return
  }
  func.func @transform_0(%arg0: i32, %arg1: i32) -> (i32, i32, i32) {
    %c0_i32 = arith.constant 0 : i32
    %c0_i32_0 = arith.constant 0 : i32
    return %arg0, %c0_i32, %arg1 : i32, i32, i32
  }
  func.func @transform_1(%arg0: i32, %arg1: i32) -> (i32, i32, i32) {
    %c0_i32 = arith.constant 0 : i32
    %c0_i32_0 = arith.constant 0 : i32
    return %arg0, %c0_i32, %arg1 : i32, i32, i32
  }
  func.func @transform_2(%arg0: i32, %arg1: i32) -> (i32, i32, i32) {
    %c0_i32 = arith.constant 0 : i32
    %c0_i32_0 = arith.constant 0 : i32
    return %arg0, %c0_i32, %arg1 : i32, i32, i32
  }
  func.func @transform_3(%arg0: i32, %arg1: i32) -> (i32, i32, i32) {
    %c0_i32 = arith.constant 0 : i32
    %c0_i32_0 = arith.constant 0 : i32
    return %arg0, %c0_i32, %arg1 : i32, i32, i32
  }
  func.func @transform_4(%arg0: i32, %arg1: i32) -> (i32, i32, i32) {
    %c0_i32 = arith.constant 0 : i32
    %c0_i32_0 = arith.constant 0 : i32
    return %arg0, %c0_i32, %arg1 : i32, i32, i32
  }
}

</mosaic_0001>

<bundles_post_ra>
// kernel: _mcl_loss_batched.2
= control target key start
LH: loop header
LB: loop body
LE: loop exit
PB: predicated region body
PF: predicated region fallthrough
CT: control target
= control target key end

     0   :  { %s557_s9 = smov 0   ;;  %s559_s10 = smov 0   ;;  %s601_s0 = inlined_call_operand.vmem [shape: f32[2,16,512], index: 0, kind: input, shape index: {}]   ;;  %s602_s1 = inlined_call_operand.vmem [shape: f32[2,1,512], index: 1, kind: input, shape index: {}]   ;;  %s603_s2 = inlined_call_operand.vmem [shape: f32[2,1,512], index: 2, kind: output, shape index: {}]  }
   0x1   :  { %s561_s11 = smov 0  }
   0x2 LB: > { %s24_s12 = sadd.s32 1, %s535_s10  ;;  %p459_p0 = scmp.ge.s32.totalorder %s539_s11, 1  ;;  %s539_s11 = sphi %s561_s11, %s12_s11   ;;  %s535_s10 = sphi %s559_s10, %s605_s10   ;;  %s531_s9 = sphi %s557_s9, %s604_s9  }
   0x3   : > { %p26_p1 = scmp.ge.s32.totalorder %s24_s12, 2  ;;  %p149_p2 = scmp.lt.s32.totalorder %s539_s11, 3 }
   0x5   : > { %s607_s12 = smov (%p26_p1, %s24_s12), 0  ;;  %p150_p3 = pnand %p459_p0, %p149_p2 }
   0x6   : > { %p187_p4 = scmp.lt.s32.totalorder (!%p150_p3), %s531_s9, 1 }
   0x7   : > { %153 = sbr.rel (%p150_p3) target bundleno = 76 (0x4c), region = 28 }
   0xc   : > { %s609_s9 = smov (!%p187_p4, %s531_s9), 1  ;;  %v257_v45 = vlaneseq  ;;  %v541_v60 = vmov 1966171168  }
   0xd   : > { %s471_s13 = sshll.u32 %s609_s9, 6  ;;  %s462_s14 = sshll.u32 %s609_s9, 2  ;;  %v332_v61 = vunpack.c.l.s4 %v541_v60 }
   0xe   : > { %s194_s17 = scalar_lea.vmem %s601_s0, %s471_s13  ;;  %s203_s20 = scalar_lea.vmem %s602_s1, %s462_s14  ;;  %v274_v52 = vshrl.u32 %v257_v45, 7  ;;  %v258_v53 = vand.u32 127, %v257_v45  ;;  %vm356_vm1 = vcmp.lt.s32.totalorder %v257_v45, 512 }
   0xf   : > { %v214_v0 = vld [vmem:[%s194_s17] sm:$0xff]  ;;  %v215_v1 = vld [vmem:[%s194_s17 + $0x8] sm:$0xff]  ;;  %v216_v2 = vld [vmem:[%s194_s17 + $0x10] sm:$0xff]  ;;  %s212_s23 = scalar_lea.vmem %s603_s2, %s462_s14 }
  0x10   : > { %v217_v3 = vld [vmem:[%s194_s17 + $0x18] sm:$0xff]  ;;  %v218_v4 = vld [vmem:[%s194_s17 + $0x20] sm:$0xff]  ;;  %v219_v5 = vld [vmem:[%s194_s17 + $0x28] sm:$0xff]  ;;  %v283_v55 = vsub.s32 2, %v274_v52  ;;  %v260_v57 = vadd.s32 256, %v258_v53  ;;  %v275_v58 = vsub.s32 0, %v274_v52 }
  0x11   : > { %v220_v6 = vld [vmem:[%s194_s17 + $0x30] sm:$0xff]  ;;  %v221_v7 = vld [vmem:[%s194_s17 + $0x38] sm:$0xff]  ;;  %v222_v8 = vmax.f32 %v214_v0, %v218_v4  ;;  %v229_v9 = vmax.f32 %v215_v1, %v219_v5  ;;  %v250_v10 = vld [vmem:[%s203_s20] sm:$0xf]  ;;  %v279_v59 = vsub.s32 1, %v274_v52  ;;  %v333_v1 = vunpack.c.0.s8 %v332_v61 }
  0x12   : > { %v236_v11 = vmax.f32 %v216_v2, %v220_v6  ;;  %v243_v12 = vmax.f32 %v217_v3, %v221_v7  ;;  %v464_v13 = vmul.f32 -1.442695, %v250_v10  ;;  %vm270_vm0 = vcmp.lt.s32.totalorder %v260_v57, 320 }
  0x13   : > { %v223_v14 = vrot.slane %v222_v8, 4  ;;  %v230_v15 = vrot.slane %v229_v9, 4 }
  0x14   : > { %v237_v16 = vrot.slane %v236_v11, 4  ;;  %v244_v17 = vrot.slane %v243_v12, 4  ;;  %497 = vpow2.f32 %v464_v13 }
  0x15   : > { %v224_v18 = vmax.f32 %v222_v8, %v223_v14  ;;  %v231_v19 = vmax.f32 %v229_v9, %v230_v15  ;;  %v336_v8 = vsub.s32 %v333_v1, %v274_v52 }
  0x16   : > { %v238_v20 = vmax.f32 %v236_v11, %v237_v16  ;;  %v245_v21 = vmax.f32 %v243_v12, %v244_v17 }
  0x17   : > { %v225_v22 = vrot.slane %v224_v18, 2  ;;  %v232_v23 = vrot.slane %v231_v19, 2 }
  0x18   : > { %v239_v24 = vrot.slane %v238_v20, 2  ;;  %v246_v25 = vrot.slane %v245_v21, 2 }
  0x19   : > { %v226_v26 = vmax.f32 %v224_v18, %v225_v22  ;;  %v233_v27 = vmax.f32 %v231_v19, %v232_v23 }
  0x1a   : > { %v240_v28 = vmax.f32 %v238_v20, %v239_v24  ;;  %v247_v29 = vmax.f32 %v245_v21, %v246_v25 }
  0x1b   : > { %v227_v30 = vrot.slane %v226_v26, 1  ;;  %v234_v31 = vrot.slane %v233_v27, 1 }
  0x1c   : > { %v241_v32 = vrot.slane %v240_v28, 1  ;;  %v248_v33 = vrot.slane %v247_v29, 1 }
  0x1d   : > { %v228_v34 = vmax.f32 %v226_v26, %v227_v30  ;;  %v235_v35 = vmax.f32 %v233_v27, %v234_v31 }
  0x1e   : > { %v242_v36 = vmax.f32 %v240_v28, %v241_v32  ;;  %v249_v37 = vmax.f32 %v247_v29, %v248_v33 }
  0x1f   : > { %v465_v38 = vmul.f32 -1.442695, %v228_v34  ;;  %v466_v39 = vmul.f32 -1.442695, %v235_v35 }
  0x20   : > { %v467_v40 = vmul.f32 -1.442695, %v242_v36  ;;  %v468_v41 = vmul.f32 -1.442695, %v249_v37 }
  0x21   : > { %499 = vpow2.f32 %v465_v38  ;;  %v498_v42 = vpop.eup %497 }
  0x22   : > { %501 = vpow2.f32 %v466_v39  ;;  %v254_v43 = vadd.f32 1.0, %v498_v42 }
  0x23   : > { %503 = vpow2.f32 %v467_v40 }
  0x24   : > { %505 = vpow2.f32 %v468_v41 }
  0x25   : > { %507 = vrcp.f32 %v254_v43 }
  0x2e   : > { %v500_v44 = vpop.eup %499 }
  0x2f   : > { %v502_v46 = vpop.eup %501  ;;  %v309_v47 = vadd.f32 1.0, %v500_v44 }
  0x30   : > { %v504_v48 = vpop.eup %503  ;;  %v310_v49 = vadd.f32 1.0, %v502_v46 }
  0x31   : > { %v311_v50 = vadd.f32 1.0, %v504_v48  ;;  %509 = vrcp.f32 %v309_v47  ;;  %v506_v51 = vpop.eup %505 }
  0x32   : > { %511 = vrcp.f32 %v310_v49  ;;  %v312_v54 = vadd.f32 1.0, %v506_v51  ;;  %v508_v56 = vpop.eup %507 }
  0x33   : > { %513 = vrcp.f32 %v311_v50  ;;  %v284_v62 = vrot.slane %v508_v56, %v283_v55  ;;  %v276_v63 = vrot.slane %v508_v56, %v275_v58  ;;  %v280_v0 = vrot.slane %v508_v56, %v279_v59 }
  0x34   : > { %515 = vrcp.f32 %v312_v54 }
  0x35   : > { %v295_v3 = vsel %vm270_vm0, %v284_v62, 1.0 }
  0x3e   : > { %v510_v2 = vpop.eup %509 }
  0x3f   : > { %v512_v4 = vpop.eup %511  ;;  %v321_v5 = vmul.f32 %v510_v2, %v276_v63 }
  0x40   : > { %v514_v6 = vpop.eup %513  ;;  %v322_v7 = vmul.f32 %v512_v4, %v280_v0 }
  0x41   : > { %v323_v9 = vmul.f32 %v514_v6, %v295_v3  ;;  %v516_v10 = vpop.eup %515 }
  0x42   : > { %v329_v11 = vcombine.low %v321_v5, %v322_v7 }
  0x43   : > { %v330_v12 = vcombine.low %v323_v9, %v516_v10 }
  0x44   : > { %v337_v13 = vrot.slane %v329_v11, %v336_v8 }
  0x45   : > { %v344_v14 = vrot.slane %v330_v12, %v336_v8 }
  0x47   : > { %v345_v15 = vcombine.low %v337_v13, %v344_v14 }
  0x49   : > { %v352_v16 = vrot.slane %v345_v15, %v336_v8 }
  0x4b   : > { %358 = vst.msk [vmem:[%s212_s23] sm:$0xf] %vm356_vm1, %v352_v16 }
  0x4c PF: > { %s12_s11 = sadd.s32 1, %s539_s11   ;;  %s604_s9 = smov %s535_s10 }
  0x4d   : > { %p9_p5 = scmp.ge.s32.totalorder %s12_s11, 4   ;;  %s605_s10 = smov %s607_s12 }
  0x4f   :  { %11 = sbr.rel (!%p9_p5) target bundleno = 2 (0x2), region = 61 }

// kernel: _mcl_loss_batched.3
= control target key start
LH: loop header
LB: loop body
LE: loop exit
PB: predicated region body
PF: predicated region fallthrough
CT: control target
= control target key end

     0   :  { %s1269_s15 = smov 0   ;;  %s1271_s16 = smov 0   ;;  %s1679_s0 = inlined_call_operand.vmem [shape: f32[2,16,512], index: 0, kind: input, shape index: {}]   ;;  %s1680_s1 = inlined_call_operand.vmem [shape: f32[2,16,512], index: 1, kind: input, shape index: {}]   ;;  %s1681_s2 = inlined_call_operand.vmem [shape: f32[2,1,512], index: 2, kind: input, shape index: {}]   ;;  %s1682_s3 = inlined_call_operand.vmem [shape: f32[2,8,512], index: 3, kind: input, shape index: {}]   ;;  %s1683_s4 = inlined_call_operand.vmem [shape: f32[2,3,512], index: 4, kind: output, shape index: {}]  }
   0x1   :  { %s1273_s17 = smov 0  }
   0x2 LB: > { %s26_s18 = sadd.s32 1, %s1237_s16  ;;  %p1050_p0 = scmp.ge.s32.totalorder %s1241_s17, 1  ;;  %s1241_s17 = sphi %s1273_s17, %s14_s17   ;;  %s1237_s16 = sphi %s1271_s16, %s1741_s16   ;;  %s1233_s15 = sphi %s1269_s15, %s1740_s15  }
   0x3   : > { %p28_p1 = scmp.ge.s32.totalorder %s26_s18, 2  ;;  %p233_p2 = scmp.lt.s32.totalorder %s1241_s17, 3 }
   0x5   : > { %s1743_s18 = smov (%p28_p1, %s26_s18), 0  ;;  %p234_p3 = pnand %p1050_p0, %p233_p2 }
   0x7   : > { %237 = sbr.rel (%p234_p3) target bundleno = 146 (0x92), region = 36 }
   0xc   : > { %p294_p4 = scmp.lt.s32.totalorder %s1233_s15, 1  ;;  %v498_v61 = vlaneseq }
   0xe   : > { %s1745_s15 = smov (!%p294_p4, %s1233_s15), 1 }
   0xf   : > { %s1086_s19 = sshll.u32 %s1745_s15, 6  ;;  %s1055_s26 = sshll.u32 %s1745_s15, 2 }
  0x10   : > { %s301_s22 = scalar_lea.vmem %s1679_s0, %s1086_s19  ;;  %s311_s25 = scalar_lea.vmem %s1680_s1, %s1086_s19 }
  0x11   : > { %v1293_v0 = vld [vmem:[%s301_s22] sm:$0xff]  ;;  %v1295_v1 = vld [vmem:[%s301_s22 + $0x8] sm:$0xff]  ;;  %v1297_v2 = vld [vmem:[%s301_s22 + $0x10] sm:$0xff]  ;;  %s320_s29 = scalar_lea.vmem %s1681_s2, %s1055_s26  ;;  %s1088_s30 = sshll.u32 %s1745_s15, 5 }
  0x12   : > { %v1299_v3 = vld [vmem:[%s301_s22 + $0x18] sm:$0xff]  ;;  %v1060_v4 = vmul.f32 -1.442695, %v1293_v0  ;;  %v1302_v5 = vld [vmem:[%s301_s22 + $0x20] sm:$0xff]  ;;  %v1061_v6 = vmul.f32 -1.442695, %v1295_v1  ;;  %s1338_s7 = scalar_lea.vmem %s1682_s3, %s1088_s30 }
  0x13   : > { %v1308_v7 = vld [vmem:[%s301_s22 + $0x28] sm:$0xff]  ;;  %v1062_v8 = vmul.f32 -1.442695, %v1297_v2  ;;  %v1311_v9 = vld [vmem:[%s301_s22 + $0x30] sm:$0xff]  ;;  %v1063_v10 = vmul.f32 -1.442695, %v1299_v3 }
  0x14   : > { %v1314_v11 = vld [vmem:[%s301_s22 + $0x38] sm:$0xff]  ;;  %1115 = vpow2.f32 %v1060_v4  ;;  %v1064_v12 = vmul.f32 -1.442695, %v1302_v5  ;;  %v1065_v13 = vmul.f32 -1.442695, %v1308_v7  ;;  %v398_v14 = vld [vmem:[%s311_s25] sm:$0xff] }
  0x15   : > { %1117 = vpow2.f32 %v1061_v6  ;;  %v1066_v15 = vmul.f32 -1.442695, %v1311_v9  ;;  %v399_v16 = vld [vmem:[%s311_s25 + $0x8] sm:$0xff]  ;;  %v1067_v17 = vmul.f32 -1.442695, %v1314_v11  ;;  %v400_v18 = vld [vmem:[%s311_s25 + $0x10] sm:$0xff] }
  0x16   : > { %1119 = vpow2.f32 %v1062_v8  ;;  %v401_v19 = vld [vmem:[%s311_s25 + $0x18] sm:$0xff]  ;;  %v1068_v20 = vmul.f32 -1.442695, %v398_v14  ;;  %v402_v21 = vld [vmem:[%s311_s25 + $0x20] sm:$0xff]  ;;  %v1069_v22 = vmul.f32 -1.442695, %v399_v16 }
  0x17   : > { %1121 = vpow2.f32 %v1063_v10  ;;  %v403_v23 = vld [vmem:[%s311_s25 + $0x28] sm:$0xff]  ;;  %v1070_v24 = vmul.f32 -1.442695, %v400_v18  ;;  %v404_v25 = vld [vmem:[%s311_s25 + $0x30] sm:$0xff]  ;;  %v1071_v26 = vmul.f32 -1.442695, %v401_v19 }
  0x18   : > { %1123 = vpow2.f32 %v1064_v12  ;;  %v405_v27 = vld [vmem:[%s311_s25 + $0x38] sm:$0xff]  ;;  %v1072_v28 = vmul.f32 -1.442695, %v402_v21  ;;  %v1073_v29 = vmul.f32 -1.442695, %v403_v23  ;;  %v1324_v8 = vshrl.u32 %v498_v61, 7 }
  0x19   : > { %1125 = vpow2.f32 %v1065_v13  ;;  %v1074_v30 = vmul.f32 -1.442695, %v404_v25  ;;  %v1075_v31 = vmul.f32 -1.442695, %v405_v27  ;;  %v454_v6 = vld [vmem:[%s320_s29] sm:$0xf] }
  0x1a   : > { %1127 = vpow2.f32 %v1066_v15  ;;  %vm455_vm0 = vcmp.gt.f32.partialorder %v454_v6, 0.0  ;;  %v500_v15 = vsub.s32 0, %v1324_v8  ;;  %vm456_vm1 = vcmp.ge.f32.partialorder %v454_v6, 0.0  ;;  %v1359_v25 = vld [vmem:[%s1338_s7 + $0x8] sm:$0xff]  ;;  %s1089_s8 = sshll.u32 %s1745_s15, 4 }
  0x1b   : > { %1129 = vpow2.f32 %v1067_v17  ;;  %v1243_v17 = vmov 0   ;;  %v512_v23 = vsub.s32 3, %v1324_v8  ;;  %1698 = vst [vmem:[#allocation3_spill] sm:$0xff] %v1359_v25  ;;  %vm652_vm3 = vcmp.gt.f32.partialorder %v1359_v25, 0.0  ;;  %s340_s11 = scalar_lea.vmem %s1683_s4, %s1089_s8 }
  0x1c   : > { %1131 = vpow2.f32 %v1068_v20  ;;  %v497_v18 = vsel %vm455_vm0, 1, %v1243_v17  ;;  %v504_v20 = vsub.s32 1, %v1324_v8  ;;  %vm727_vm0 = vcmask 1044480  }
  0x1d   : > { %1133 = vpow2.f32 %v1069_v22  ;;  %v508_v22 = vsub.s32 2, %v1324_v8 }
  0x1e   : > { %1135 = vpow2.f32 %v1070_v24  ;;  %v1356_v24 = vld [vmem:[%s1338_s7] sm:$0xff] }
  0x1f   : > { %1137 = vpow2.f32 %v1071_v26  ;;  %1697 = vst [vmem:[#allocation2_spill] sm:$0xff] %v1356_v24  ;;  %v1362_v26 = vsub.s32 7, %v1324_v8  ;;  %vm651_vm2 = vcmp.gt.f32.partialorder %v1356_v24, 0.0 }
  0x20   : > { %1139 = vpow2.f32 %v1072_v28  ;;  %v1367_v28 = vrot.slane %v497_v18, %v500_v15 }
  0x21   : > { %v1116_v32 = vpop.eup %1115  ;;  %1141 = vpow2.f32 %v1073_v29  ;;  %v590_v29 = vsel %vm456_vm1, 1, %v1243_v17 }
  0x22   : > { %v1118_v33 = vpop.eup %1117  ;;  %1143 = vpow2.f32 %v1074_v30  ;;  %v374_v36 = vadd.f32 1.0, %v1116_v32  ;;  %v655_v32 = vand.u32 2147483647, %v1356_v24  ;;  %vm514_vm4 = vcmp.eq.s32.totalorder %v1367_v28, 1 }
  0x23   : > { %v1120_v34 = vpop.eup %1119  ;;  %1145 = vpow2.f32 %v1075_v31  ;;  %v375_v38 = vadd.f32 1.0, %v1118_v33  ;;  %v1375_v31 = vld [vmem:[%s1338_s7 + $0x10] sm:$0xff]  ;;  %v656_v33 = vand.u32 2147483647, %v1359_v25 }
  0x24   : > { %v1122_v35 = vpop.eup %1121  ;;  %v376_v40 = vadd.f32 1.0, %v1120_v34  ;;  %1147 = vrcp.f32 %v374_v36  ;;  %1700 = vst [vmem:[#allocation5_spill] sm:$0xff] %v1375_v31  ;;  %v663_v34 = vmul.f32 0.5, %v1356_v24  ;;  %v657_v36 = vand.u32 2147483647, %v1375_v31 }
  0x25   : > { %v1124_v37 = vpop.eup %1123  ;;  %v377_v42 = vadd.f32 1.0, %v1122_v35  ;;  %1149 = vrcp.f32 %v375_v38  ;;  %v665_v38 = vmul.f32 0.5, %v1375_v31  ;;  %vm1405_vm5 = vcmp.lt.f32.partialorder %v655_v32, 1.0 }
  0x26   : > { %v1126_v39 = vpop.eup %1125  ;;  %v378_v44 = vadd.f32 1.0, %v1124_v37  ;;  %1151 = vrcp.f32 %v376_v40  ;;  %v664_v37 = vmul.f32 0.5, %v1359_v25  ;;  %v1385_v40 = vrot.slane %v497_v18, %v504_v20 }
  0x27   : > { %v1128_v41 = vpop.eup %1127  ;;  %v379_v46 = vadd.f32 1.0, %v1126_v39  ;;  %1153 = vrcp.f32 %v377_v42  ;;  %v1393_v42 = vrot.slane %v497_v18, %v512_v23  ;;  %vm1414_vm8 = vcmp.lt.f32.partialorder %v656_v33, 1.0 }
  0x28   : > { %v1130_v43 = vpop.eup %1129  ;;  %v380_v48 = vadd.f32 1.0, %v1128_v41  ;;  %1155 = vrcp.f32 %v378_v44  ;;  %v1389_v41 = vrot.slane %v497_v18, %v508_v22  ;;  %vm515_vm6 = vcmp.eq.s32.totalorder %v1385_v40, 1 }
  0x29   : > { %v1132_v45 = vpop.eup %1131  ;;  %v381_v50 = vadd.f32 1.0, %v1130_v43  ;;  %1157 = vrcp.f32 %v379_v46  ;;  %v1396_v43 = vld [vmem:[%s1338_s7 + $0x18] sm:$0xff]  ;;  %v1400_v46 = vrot.slane %v590_v29, %v504_v20  ;;  %vm1418_vm9 = vcmp.lt.f32.partialorder %v657_v36, 1.0 }
  0x2a   : > { %v1134_v47 = vpop.eup %1133  ;;  %v430_v52 = vadd.f32 1.0, %v1132_v45  ;;  %1159 = vrcp.f32 %v380_v48  ;;  %v1398_v45 = vrot.slane %v590_v29, %v500_v15  ;;  %v666_v48 = vmul.f32 0.5, %v1396_v43 }
  0x2b   : > { %v1136_v49 = vpop.eup %1135  ;;  %v431_v54 = vadd.f32 1.0, %v1134_v47  ;;  %1161 = vrcp.f32 %v381_v50  ;;  %1702 = vst [vmem:[#allocation7_spill] sm:$0xff] %v1400_v46  ;;  %v658_v47 = vand.u32 2147483647, %v1396_v43  ;;  %vm516_vm7 = vcmp.eq.s32.totalorder %v1389_v41, 1 }
  0x2c   : > { %v1138_v51 = vpop.eup %1137  ;;  %v432_v56 = vadd.f32 1.0, %v1136_v49  ;;  %1163 = vrcp.f32 %v430_v52  ;;  %1701 = vst [vmem:[#allocation6_spill] sm:$0xff] %v1398_v45  ;;  %v1076_v52 = vadd.f32 -0.5, %v655_v32  ;;  %vm517_vm10 = vcmp.eq.s32.totalorder %v1393_v42, 1 }
  0x2d   : > { %v1140_v53 = vpop.eup %1139  ;;  %v433_v58 = vadd.f32 1.0, %v1138_v51  ;;  %1165 = vrcp.f32 %v431_v54  ;;  %v667_v51 = vmul.f32 %v663_v34, %v1356_v24  ;;  %v668_v54 = vmul.f32 %v664_v37, %v1359_v25 }
  0x2e   : > { %v1142_v55 = vpop.eup %1141  ;;  %v434_v60 = vadd.f32 1.0, %v1140_v53  ;;  %1167 = vrcp.f32 %v432_v56  ;;  %v1077_v56 = vadd.f32 -0.5, %v656_v33  ;;  %vm1430_vm11 = vcmp.lt.f32.partialorder %v658_v47, 1.0 }
  0x2f   : > { %v1144_v57 = vpop.eup %1143  ;;  %v435_v62 = vadd.f32 1.0, %v1142_v55  ;;  %1169 = vrcp.f32 %v433_v58  ;;  %v669_v55 = vmul.f32 %v665_v38, %v1375_v31  ;;  %v1711_v15 = vmov 0 }
  0x30   : > { %v1146_v59 = vpop.eup %1145  ;;  %v436_v63 = vadd.f32 1.0, %v1144_v57  ;;  %1171 = vrcp.f32 %v434_v60  ;;  %v1078_v57 = vadd.f32 -0.5, %v657_v36  ;;  %v1712_v15 = vsel %vm1430_vm11, 4294967295, %v1711_v15 }
  0x31   : > { %v437_v4 = vadd.f32 1.0, %v1146_v59  ;;  %v1326_v10 = vpop.eup %1147  ;;  %1173 = vrcp.f32 %v435_v62  ;;  %v1424_v62 = vmul.f32 %v666_v48, %v1396_v43  ;;  %1713 = vst [vmem:[#allocation10_spill] sm:$0xff] %v1712_v15  ;;  %v675_v18 = vsel %vm1405_vm5, %v667_v51, %v1076_v52 }
  0x32   : > { %v1329_v12 = vpop.eup %1149  ;;  %1175 = vrcp.f32 %v436_v63  ;;  %v1426_v63 = vadd.f32 -0.5, %v658_v47  ;;  %v686_v20 = vrot.slane %v1359_v25, %v1362_v26  ;;  %v690_v32 = vrot.slane %v1375_v31, %v1362_v26 }
  0x33   : > { %v1331_v13 = vpop.eup %1151  ;;  %1177 = vrcp.f32 %v437_v4  ;;  %1709 = vst [vmem:[#allocation8_spill] sm:$0xff] %v1424_v62  ;;  %v682_v4 = vrot.slane %v1356_v24, %v1362_v26  ;;  %vm653_vm12 = vcmp.gt.f32.partialorder %v1375_v31, 0.0  ;;  %vm654_vm13 = vcmp.gt.f32.partialorder %v1396_v43, 0.0 }
  0x34   : > { %v1333_v14 = vpop.eup %1153  ;;  %1179 = vlog2.f32 %v1326_v10  ;;  %1710 = vst [vmem:[#allocation9_spill] sm:$0xff] %v1426_v63  ;;  %v676_v34 = vsel %vm1414_vm8, %v668_v54, %v1077_v56  ;;  %v677_v36 = vsel %vm1418_vm9, %v669_v55, %v1078_v57  ;;  %v1448_v38 = vrot.slane %v590_v29, %v508_v22 }
  0x35   : > { %v1342_v16 = vpop.eup %1155  ;;  %1181 = vlog2.f32 %v1329_v12  ;;  %v1452_v47 = vrot.slane %v590_v29, %v512_v23  ;;  %v699_v48 = vsel %vm651_vm2, 1, %v1243_v17  ;;  %v700_v50 = vsel %vm652_vm3, 1, %v1243_v17 }
  0x36   : > { %v1346_v19 = vpop.eup %1157  ;;  %1183 = vlog2.f32 %v1331_v13  ;;  %1714 = vst [vmem:[#allocation11_spill] sm:$0xff] %v1448_v38  ;;  %v1472_v23 = vmul.f32 %v682_v4, %v675_v18  ;;  %v1474_v54 = vmul.f32 %v686_v20, %v676_v34  ;;  %v1476_v55 = vmul.f32 %v690_v32, %v677_v36 }
  0x37   : > { %v1350_v21 = vpop.eup %1159  ;;  %1185 = vlog2.f32 %v1333_v14  ;;  %1715 = vst [vmem:[#allocation12_spill] sm:$0xff] %v1452_v47  ;;  %v706_v57 = vrot.slane %v699_v48, %v1362_v26  ;;  %v710_v59 = vrot.slane %v700_v50, %v1362_v26  ;;  %v1080_v60 = vmul.f32 -1.442695, %v1356_v24 }
  0x38   : > { %v1364_v27 = vpop.eup %1161  ;;  %1187 = vlog2.f32 %v1342_v16  ;;  %1716 = vst [vmem:[#allocation13_spill] sm:$0xff] %v1476_v55  ;;  %v1081_v4 = vmul.f32 -1.442695, %v1359_v25  ;;  %vm888_vm9 = vcmask 1040384  }
  0x39   : > { %1699 = vst [vmem:[#allocation4_spill] sm:$0xff] %v1364_v27  ;;  %v1164_v30 = vpop.eup %1163  ;;  %1189 = vlog2.f32 %v1346_v19  ;;  %vm1528_vm14 = vcmp.eq.s32.totalorder %v706_v57, 1  ;;  %vm1535_vm15 = vcmp.eq.s32.totalorder %v710_v59, 1  ;;  %v1083_v57 = vmul.f32 -1.442695, %v1396_v43 }
  0x3a   : > { %v1166_v35 = vpop.eup %1165  ;;  %1191 = vlog2.f32 %v1350_v21  ;;  %v1462_v52 = vsel %vm514_vm4, %v1164_v30, 0.0  ;;  %v1481_v30 = vsel %vm653_vm12, 1, %v1243_v17 }
  0x3b   : > { %v1168_v39 = vpop.eup %1167  ;;  %1193 = vlog2.f32 %v1364_v27  ;;  %v1466_v22 = vsel %vm515_vm6, %v1166_v35, 0.0  ;;  %v1486_v35 = vsel %vm654_vm13, 1, %v1243_v17  ;;  %v534_v17 = vsub.f32 1.0, %v1462_v52 }
  0x3c   : > { %v1170_v44 = vpop.eup %1169  ;;  %1717 = vst [vmem:[#allocation14_spill] sm:$0xff] %v1486_v35  ;;  %v1494_v20 = vsel %vm516_vm7, %v1168_v39, 0.0  ;;  %v535_v34 = vsub.f32 1.0, %v1466_v22  ;;  %1195 = vpow2.f32 %v1080_v60 }
  0x3d   : > { %v1172_v49 = vpop.eup %1171  ;;  %v1498_v32 = vsel %vm517_vm10, %v1170_v44, 0.0  ;;  %v536_v28 = vsub.f32 1.0, %v1494_v20  ;;  %1197 = vpow2.f32 %v1081_v4 }
  0x3e   : > { %v1174_v53 = vpop.eup %1173  ;;  %v1504_v8 = vsel %vm514_vm4, %v1172_v49, 0.0  ;;  %v537_v49 = vsub.f32 1.0, %v1498_v32 }
  0x3f   : > { %v1176_v58 = vpop.eup %1175  ;;  %v1508_v25 = vsel %vm515_vm6, %v1174_v53, 0.0  ;;  %v538_v53 = vsub.f32 1.0, %v1504_v8  ;;  %v570_v15 = vsub.f32 %v1504_v8, %v1342_v16 }
  0x40   : > { %v1178_v61 = vpop.eup %1177  ;;  %v1512_v44 = vsel %vm516_vm7, %v1176_v58, 0.0 }
  0x41   : > { %v1180_v6 = vpop.eup %1179  ;;  %v1516_v47 = vsel %vm517_vm10, %v1178_v61, 0.0  ;;  %v540_v42 = vsub.f32 1.0, %v1512_v44  ;;  %vm893_vm10 = vcmask 1041408  }
  0x42   : > { %v1182_v33 = vpop.eup %1181  ;;  %v458_v48 = vmul.f32 0.6931472, %v1180_v6  ;;  %v541_v61 = vsub.f32 1.0, %v1516_v47 }
  0x43   : > { %v1184_v37 = vpop.eup %1183  ;;  %v460_v50 = vmul.f32 0.6931472, %v1182_v33 }
  0x44   : > { %v1186_v51 = vpop.eup %1185  ;;  %v462_v6 = vmul.f32 0.6931472, %v1184_v37  ;;  %v481_v41 = vsub.f32 %v458_v48, %v1293_v0 }
  0x45   : > { %v1188_v29 = vpop.eup %1187  ;;  %v464_v33 = vmul.f32 0.6931472, %v1186_v51  ;;  %v482_v58 = vsub.f32 %v460_v50, %v1295_v1  ;;  %v474_v62 = vmax.f32 %v460_v50, -100.0 }
  0x46   : > { %v1190_v56 = vpop.eup %1189  ;;  %v466_v39 = vmul.f32 0.6931472, %v1188_v29  ;;  %v539_v29 = vsub.f32 1.0, %v1508_v25  ;;  %v483_v0 = vsub.f32 %v462_v6, %v1297_v2  ;;  %v475_v60 = vmax.f32 %v462_v6, -100.0 }
  0x47   : > { %v1192_v18 = vpop.eup %1191  ;;  %v468_v24 = vmul.f32 0.6931472, %v1190_v56  ;;  %v484_v1 = vsub.f32 %v464_v33, %v1299_v3  ;;  %v476_v3 = vmax.f32 %v464_v33, -100.0  ;;  %v527_v4 = vmul.f32 %v1466_v22, %v474_v62 }
  0x48   : > { %v1194_v36 = vpop.eup %1193  ;;  %v470_v63 = vmul.f32 0.6931472, %v1192_v18  ;;  %v485_v37 = vsub.f32 %v466_v39, %v1302_v5  ;;  %v1082_v18 = vmul.f32 -1.442695, %v1375_v31  ;;  %v477_v55 = vmax.f32 %v466_v39, -100.0 }
  0x49   : > { %v472_v40 = vmul.f32 0.6931472, %v1194_v36  ;;  %v486_v51 = vsub.f32 %v468_v24, %v1308_v7  ;;  %v473_v36 = vmax.f32 %v458_v48, -100.0  ;;  %v489_v31 = vmax.f32 %v481_v41, -100.0 }
  0x4a   : > { %v487_v5 = vsub.f32 %v470_v63, %v1311_v9  ;;  %v490_v48 = vmax.f32 %v482_v58, -100.0  ;;  %v478_v50 = vmax.f32 %v468_v24, -100.0  ;;  %v493_v38 = vmax.f32 %v485_v37, -100.0 }
  0x4b   : > { %v488_v7 = vsub.f32 %v472_v40, %v1314_v11  ;;  %v494_v2 = vmax.f32 %v486_v51, -100.0  ;;  %1199 = vpow2.f32 %v1082_v18  ;;  %v479_v59 = vmax.f32 %v470_v63, -100.0 }
  0x4c   : > { %v491_v46 = vmax.f32 %v483_v0, -100.0  ;;  %v492_v35 = vmax.f32 %v484_v1, -100.0  ;;  %v480_v45 = vmax.f32 %v472_v40, -100.0  ;;  %v495_v27 = vmax.f32 %v487_v5, -100.0 }
  0x4d   : > { %v496_v9 = vmax.f32 %v488_v7, -100.0  ;;  %1201 = vpow2.f32 %v1083_v57  ;;  %v526_v11 = vmul.f32 %v1462_v52, %v473_v36  ;;  %v542_v6 = vmul.f32 %v534_v17, %v489_v31  ;;  %v1723_v57 = vld [vmem:[#allocation6_spill] sm:$0xff] }
  0x4e   : > { %v543_v39 = vmul.f32 %v535_v34, %v490_v48  ;;  %v530_v41 = vmul.f32 %v1504_v8, %v477_v55  ;;  %v531_v24 = vmul.f32 %v1508_v25, %v478_v50  ;;  %v546_v58 = vmul.f32 %v538_v53, %v493_v38 }
  0x4f   : > { %v547_v37 = vmul.f32 %v539_v29, %v494_v2  ;;  %v528_v63 = vmul.f32 %v1494_v20, %v475_v60  ;;  %v529_v33 = vmul.f32 %v1498_v32, %v476_v3  ;;  %v544_v40 = vmul.f32 %v536_v28, %v491_v46 }
  0x50   : > { %v545_v51 = vmul.f32 %v537_v49, %v492_v35  ;;  %v532_v18 = vmul.f32 %v1512_v44, %v479_v59  ;;  %v533_v36 = vmul.f32 %v1516_v47, %v480_v45  ;;  %v548_v62 = vmul.f32 %v540_v42, %v495_v27  ;;  %v1196_v27 = vpop.eup %1195 }
  0x51   : > { %v549_v31 = vmul.f32 %v541_v61, %v496_v9  ;;  %v550_v17 = vadd.f32 %v542_v6, %v526_v11  ;;  %v551_v34 = vadd.f32 %v543_v39, %v527_v4  ;;  %v714_v55 = vrot.slane %v1481_v30, %v1362_v26  ;;  %v1726_v9 = vld [vmem:[#allocation14_spill] sm:$0xff] }
  0x52   : > { %v723_v38 = vsel %vm1528_vm14, %v1472_v23, 0.0  ;;  %v554_v53 = vadd.f32 %v546_v58, %v530_v41  ;;  %v555_v29 = vadd.f32 %v547_v37, %v531_v24  ;;  %v566_v46 = vsub.f32 %v1462_v52, %v1326_v10  ;;  %v1198_v10 = vpop.eup %1197  ;;  %v1727_v24 = vld [vmem:[#allocation7_spill] sm:$0xff]  ;;  %v1729_v37 = vld [vmem:[#allocation13_spill] sm:$0xff] }
  0x53   : > { %v724_v45 = vsel %vm1535_vm15, %v1474_v54, 0.0  ;;  %v552_v35 = vadd.f32 %v544_v40, %v528_v63  ;;  %v553_v28 = vadd.f32 %v545_v51, %v529_v33  ;;  %v567_v49 = vsub.f32 %v1466_v22, %v1329_v12  ;;  %v1728_v58 = vld [vmem:[#allocation11_spill] sm:$0xff] }
  0x54   : > { %v568_v30 = vsub.f32 %v1494_v20, %v1331_v13  ;;  %v556_v42 = vadd.f32 %v548_v62, %v532_v18  ;;  %v557_v23 = vadd.f32 %v549_v31, %v533_v36  ;;  %v569_v61 = vsub.f32 %v1498_v32, %v1333_v14  ;;  %v1722_v32 = vld [vmem:[#allocation4_spill] sm:$0xff] }
  0x55   : > { %v768_v56 = vadd.f32 1.0, %v1196_v27  ;;  %v558_v52 = vsub.f32 0.0, %v550_v17  ;;  %v559_v0 = vsub.f32 0.0, %v551_v34  ;;  %v571_v54 = vsub.f32 %v1508_v25, %v1346_v19  ;;  %v1731_v31 = vld [vmem:[#allocation8_spill] sm:$0xff]  ;;  %v1732_v17 = vld [vmem:[#allocation9_spill] sm:$0xff] }
  0x56   : > { %v562_v1 = vsub.f32 0.0, %v554_v53  ;;  %v563_v12 = vsub.f32 0.0, %v555_v29  ;;  %v769_v22 = vadd.f32 1.0, %v1198_v10  ;;  %v560_v20 = vsub.f32 0.0, %v552_v35  ;;  %v1736_v35 = vld [vmem:[#allocation12_spill] sm:$0xff] }
  0x57   : > { %1203 = vrcp.f32 %v768_v56  ;;  %v561_v5 = vsub.f32 0.0, %v553_v28  ;;  %v572_v14 = vsub.f32 %v1512_v44, %v1350_v21  ;;  %v573_v7 = vsub.f32 %v1516_v47, %v1722_v32 }
  0x58   : > { %v1200_v13 = vpop.eup %1199  ;;  %vm607_vm1 = vcmp.eq.s32.totalorder %v1723_v57, 1  ;;  %v564_v60 = vsub.f32 0.0, %v556_v42  ;;  %v565_v16 = vsub.f32 0.0, %v557_v23  ;;  %1205 = vrcp.f32 %v769_v22 }
  0x59   : > { %v770_v8 = vadd.f32 1.0, %v1200_v13  ;;  %v574_v25 = vmul.f32 %v566_v46, %v558_v52  ;;  %v575_v48 = vmul.f32 %v567_v49, %v559_v0  ;;  %vm1575_vm4 = vcmp.eq.s32.totalorder %v714_v55, 1 }
  0x5a   : > { %v1202_v19 = vpop.eup %1201  ;;  %v728_v2 = vsel %vm727_vm0, %v723_v38, 0.0  ;;  %v578_v3 = vmul.f32 %v570_v15, %v562_v1  ;;  %v579_v21 = vmul.f32 %v571_v54, %v563_v12  ;;  %v576_v47 = vmul.f32 %v568_v30, %v560_v20 }
  0x5b   : > { %v771_v44 = vadd.f32 1.0, %v1202_v19  ;;  %1207 = vrcp.f32 %v770_v8  ;;  %v694_v59 = vrot.slane %v1396_v43, %v1362_v26  ;;  %v718_v11 = vrot.slane %v1726_v9, %v1362_v26 }
  0x5c   : > { %v735_v4 = vsel %vm727_vm0, %v724_v45, 0.0  ;;  %v577_v6 = vmul.f32 %v569_v61, %v561_v5  ;;  %v580_v39 = vmul.f32 %v572_v14, %v564_v60  ;;  %v581_v41 = vmul.f32 %v573_v7, %v565_v16 }
  0x5d   : > { %1209 = vrcp.f32 %v771_v44  ;;  %vm608_vm5 = vcmp.eq.s32.totalorder %v1727_v24, 1  ;;  %vm609_vm6 = vcmp.eq.s32.totalorder %v1728_v58, 1  ;;  %v725_v63 = vsel %vm1575_vm4, %v1729_v37, 0.0 }
  0x5e   : > { %v729_v33 = vrot.slane %v728_v2, 4  ;;  %v582_v40 = vmul.f32 %v574_v25, %v566_v46  ;;  %v583_v51 = vmul.f32 %v575_v48, %v567_v49  ;;  %v586_v18 = vmul.f32 %v578_v3, %v570_v15 }
  0x5f   : > { %v587_v36 = vmul.f32 %v579_v21, %v571_v54  ;;  %v584_v26 = vmul.f32 %v576_v47, %v568_v30  ;;  %v1733_v34 = vsel %vm1430_vm11, %v1731_v31, %v1732_v17  ;;  %vm1595_vm7 = vcmp.eq.s32.totalorder %v718_v11, 1 }
  0x60   : > { %v698_v55 = vmul.f32 %v694_v59, %v1733_v34  ;;  %v736_v53 = vrot.slane %v735_v4, 4  ;;  %v585_v29 = vmul.f32 %v577_v6, %v569_v61  ;;  %v588_v45 = vmul.f32 %v580_v39, %v572_v14 }
  0x61   : > { %v589_v27 = vmul.f32 %v581_v41, %v573_v7  ;;  %v742_v46 = vsel %vm727_vm0, %v725_v63, 0.0  ;;  %vm610_vm8 = vcmp.eq.s32.totalorder %v1736_v35, 1  ;;  %v730_v28 = vadd.f32 %v729_v33, %v728_v2 }
  0x62   : > { %v611_v49 = vsel %vm607_vm1, %v582_v40, 0.0  ;;  %v612_v30 = vsel %vm608_vm5, %v583_v51, 0.0  ;;  %v615_v42 = vsel %vm607_vm1, %v586_v18, 0.0  ;;  %v616_v23 = vsel %vm608_vm5, %v587_v36, 0.0 }
  0x63   : > { %v613_v56 = vsel %vm609_vm6, %v584_v26, 0.0  ;;  %v726_v10 = vsel %vm1595_vm7, %v698_v55, 0.0  ;;  %v737_v52 = vadd.f32 %v736_v53, %v735_v4  ;;  %v743_v0 = vrot.slane %v742_v46, 4  ;;  %v1737_v26 = vld [vmem:[#allocation2_spill] sm:$0xff] }
  0x64   : > { %v1609_v61 = vpop.eup %1203  ;;  %v614_v15 = vsel %vm610_vm8, %v585_v29, 0.0  ;;  %v617_v54 = vsel %vm609_vm6, %v588_v45, 0.0  ;;  %v618_v1 = vsel %vm610_vm8, %v589_v27, 0.0  ;;  %v619_v22 = vadd.f32 %v615_v42, %v611_v49  ;;  %v1738_v27 = vld [vmem:[#allocation3_spill] sm:$0xff] }
  0x65   : > { %1211 = vlog2.f32 %v1609_v61  ;;  %v1618_v12 = vpop.eup %1205  ;;  %v626_v13 = vadd.f32 %v616_v23, %v612_v30  ;;  %v731_v20 = vrot.slane %v730_v28, 2  ;;  %v749_v5 = vsel %vm727_vm0, %v726_v10, 0.0 }
  0x66   : > { %1213 = vlog2.f32 %v1618_v12  ;;  %v633_v32 = vadd.f32 %v617_v54, %v613_v56  ;;  %v640_v7 = vadd.f32 %v618_v1, %v614_v15  ;;  %v738_v57 = vrot.slane %v737_v52, 2  ;;  %v1739_v54 = vld [vmem:[#allocation5_spill] sm:$0xff] }
  0x67   : > { %v744_v60 = vadd.f32 %v743_v0, %v742_v46  ;;  %v620_v8 = vrot.slane %v619_v22, 4  ;;  %v627_v19 = vrot.slane %v626_v13, 4  ;;  %v750_v25 = vrot.slane %v749_v5, 4 }
  0x68   : > { %v1622_v14 = vpop.eup %1207  ;;  %v732_v48 = vadd.f32 %v731_v20, %v730_v28  ;;  %v634_v50 = vrot.slane %v633_v32, 4  ;;  %v641_v2 = vrot.slane %v640_v7, 4  ;;  %v739_v3 = vadd.f32 %v738_v57, %v737_v52 }
  0x69   : > { %1215 = vlog2.f32 %v1622_v14  ;;  %v745_v21 = vrot.slane %v744_v60, 2  ;;  %v621_v44 = vadd.f32 %v620_v8, %v619_v22  ;;  %v628_v47 = vadd.f32 %v627_v19, %v626_v13 }
  0x6a   : > { %v1625_v16 = vpop.eup %1209  ;;  %v751_v59 = vadd.f32 %v750_v25, %v749_v5  ;;  %v733_v9 = vrot.slane %v732_v48, 1  ;;  %v635_v11 = vadd.f32 %v634_v50, %v633_v32  ;;  %v642_v4 = vadd.f32 %v641_v2, %v640_v7 }
  0x6b   : > { %1217 = vlog2.f32 %v1625_v16  ;;  %v740_v6 = vrot.slane %v739_v3, 1  ;;  %v746_v39 = vadd.f32 %v745_v21, %v744_v60  ;;  %v622_v24 = vrot.slane %v621_v44, 2 }
  0x6c   : > { %v629_v58 = vrot.slane %v628_v47, 2  ;;  %v752_v37 = vrot.slane %v751_v59, 2  ;;  %v1628_v63 = vadd.f32 %v733_v9, %v732_v48  ;;  %v636_v51 = vrot.slane %v635_v11, 2 }
  0x6d   : > { %v643_v18 = vrot.slane %v642_v4, 2  ;;  %v1630_v36 = vadd.f32 %v740_v6, %v739_v3  ;;  %v848_v62 = vrot.slane %v1737_v26, 1  ;;  %v747_v31 = vrot.slane %v746_v39, 1 }
  0x6e   : > { %v623_v53 = vadd.f32 %v622_v24, %v621_v44  ;;  %v630_v29 = vadd.f32 %v629_v58, %v628_v47  ;;  %v753_v45 = vadd.f32 %v752_v37, %v751_v59  ;;  %v849_v46 = vrot.slane %v1738_v27, 1 }
  0x6f   : > { %v637_v23 = vadd.f32 %v636_v51, %v635_v11  ;;  %v816_v10 = vsub.f32 1.0, %v1609_v61  ;;  %v817_v52 = vsub.f32 1.0, %v1618_v12  ;;  %v818_v5 = vsub.f32 1.0, %v1622_v14 }
  0x70   : > { %v819_v25 = vsub.f32 1.0, %v1625_v16  ;;  %v644_v47 = vadd.f32 %v643_v18, %v642_v4  ;;  %v748_v11 = vadd.f32 %v747_v31, %v746_v39  ;;  %v631_v58 = vrot.slane %v630_v29, 1 }
  0x71   : > { %v851_v4 = vrot.slane %v1396_v43, 1 }
  0x72   : > { %v1212_v41 = vpop.eup %1211 }
  0x73   : > { %v781_v33 = vmul.f32 0.6931472, %v1212_v41  ;;  %v1214_v40 = vpop.eup %1213 }
  0x74   : > { %v783_v17 = vmul.f32 0.6931472, %v1214_v40  ;;  %v754_v40 = vrot.slane %v753_v45, 1 }
  0x75   : > { %v788_v34 = vmax.f32 %v781_v33, -100.0  ;;  %v792_v55 = vsub.f32 %v781_v33, %v1737_v26 }
  0x76   : > { %v1216_v38 = vpop.eup %1215  ;;  %v789_v28 = vmax.f32 %v783_v17, -100.0  ;;  %v793_v49 = vsub.f32 %v783_v17, %v1738_v27 }
  0x77   : > { %v785_v35 = vmul.f32 0.6931472, %v1216_v38  ;;  %v796_v30 = vmax.f32 %v792_v55, -100.0  ;;  %v804_v56 = vrot.slane %v788_v34, 7  ;;  %v850_v34 = vrot.slane %v1739_v54, 1 }
  0x78   : > { %v1218_v42 = vpop.eup %1217  ;;  %v797_v22 = vmax.f32 %v793_v49, -100.0  ;;  %v805_v13 = vrot.slane %v789_v28, 7  ;;  %v645_v38 = vrot.slane %v644_v47, 1 }
  0x79   : > { %v787_v0 = vmul.f32 0.6931472, %v1218_v42  ;;  %v790_v15 = vmax.f32 %v785_v35, -100.0  ;;  %v794_v1 = vsub.f32 %v785_v35, %v1739_v54  ;;  %v812_v20 = vmul.f32 %v1609_v61, %v804_v56 }
  0x7a   : > { %v824_v32 = vrot.slane %v796_v30, 7  ;;  %v813_v19 = vmul.f32 %v1618_v12, %v805_v13  ;;  %v825_v48 = vrot.slane %v797_v22, 7  ;;  %v624_v61 = vrot.slane %v623_v53, 1 }
  0x7b   : > { %v791_v7 = vmax.f32 %v787_v0, -100.0  ;;  %v795_v57 = vsub.f32 %v787_v0, %v1396_v43  ;;  %v798_v60 = vmax.f32 %v794_v1, -100.0  ;;  %v806_v8 = vrot.slane %v790_v15, 7 }
  0x7c   : > { %v832_v50 = vmul.f32 %v824_v32, %v816_v10  ;;  %v833_v59 = vmul.f32 %v825_v48, %v817_v52  ;;  %v638_v12 = vrot.slane %v637_v23, 1  ;;  %v755_v30 = vadd.f32 %v754_v40, %v753_v45 }
  0x7d   : > { %v799_v2 = vmax.f32 %v795_v57, -100.0  ;;  %v807_v3 = vrot.slane %v791_v7, 7  ;;  %v814_v21 = vmul.f32 %v1622_v14, %v806_v8  ;;  %v826_v44 = vrot.slane %v798_v60, 7 }
  0x7e   : > { %v836_v9 = vadd.f32 %v832_v50, %v812_v20  ;;  %v837_v37 = vadd.f32 %v833_v59, %v813_v19  ;;  %v625_v14 = vadd.f32 %v624_v61, %v623_v53  ;;  %v639_v35 = vadd.f32 %v638_v12, %v637_v23 }
  0x7f   : > { %v815_v6 = vmul.f32 %v1625_v16, %v807_v3  ;;  %v827_v41 = vrot.slane %v799_v2, 7  ;;  %v834_v24 = vmul.f32 %v826_v44, %v818_v5  ;;  %v632_v16 = vadd.f32 %v631_v58, %v630_v29 }
  0x80   : > { %v840_v33 = vsub.f32 0.0, %v836_v9  ;;  %v841_v55 = vsub.f32 0.0, %v837_v37  ;;  %v889_v52 = vsel %vm888_vm9, %v625_v14, %v1628_v63 }
  0x81   : > { %v835_v51 = vmul.f32 %v827_v41, %v819_v25  ;;  %v838_v17 = vadd.f32 %v834_v24, %v814_v21  ;;  %v890_v45 = vsel %vm888_vm9, %v632_v16, %v1630_v36 }
  0x82   : > { %v856_v18 = vmul.f32 %v848_v62, %v840_v33  ;;  %v857_v28 = vmul.f32 %v849_v46, %v841_v55  ;;  %v646_v62 = vadd.f32 %v645_v38, %v644_v47  ;;  %v891_v46 = vsel %vm888_vm9, %v639_v35, %v748_v11 }
  0x83   : > { %v839_v39 = vadd.f32 %v835_v51, %v815_v6  ;;  %v842_v31 = vsub.f32 0.0, %v838_v17 }
  0x84   : > { %v864_v49 = vrot.slane %v856_v18, 7  ;;  %v865_v10 = vrot.slane %v857_v28, 7  ;;  %v892_v20 = vsel %vm888_vm9, %v646_v62, %v755_v30 }
  0x85   : > { %v843_v42 = vsub.f32 0.0, %v839_v39  ;;  %v858_v56 = vmul.f32 %v850_v34, %v842_v31 }
  0x86   : > { %v872_v53 = vsel %vm651_vm2, %v864_v49, 0.0  ;;  %v873_v29 = vsel %vm652_vm3, %v865_v10, 0.0 }
  0x87   : > { %v859_v0 = vmul.f32 %v851_v4, %v843_v42  ;;  %v866_v15 = vrot.slane %v858_v56, 7  ;;  %v880_v1 = vrot.slane %v872_v53, 5  ;;  %v881_v22 = vrot.slane %v873_v29, 5 }
  0x89   : > { %v867_v23 = vrot.slane %v859_v0, 7  ;;  %v874_v26 = vsel %vm653_vm12, %v866_v15, 0.0  ;;  %v894_v63 = vsel %vm893_vm10, %v889_v52, %v880_v1  ;;  %v895_v36 = vsel %vm893_vm10, %v890_v45, %v881_v22 }
  0x8a   : > { %v882_v13 = vrot.slane %v874_v26, 5  ;;  %v902_v54 = vcombine.low %v894_v63, %v895_v36 }
  0x8b   : > { %v875_v27 = vsel %vm654_vm13, %v867_v23, 0.0 }
  0x8c   : > { %v883_v5 = vrot.slane %v875_v27, 5  ;;  %v896_v32 = vsel %vm893_vm10, %v891_v46, %v882_v13  ;;  %906 = vst [vmem:[%s340_s11] sm:$0x77] %v902_v54 }
  0x8e   : > { %v897_v7 = vsel %vm893_vm10, %v892_v20, %v883_v5 }
  0x8f   : > { %v903_v57 = vcombine.low %v896_v32, %v897_v7 }
  0x91   : > { %907 = vst [vmem:[%s340_s11 + $0x8] sm:$0x77] %v903_v57 }
  0x92 PF: > { %s14_s17 = sadd.s32 1, %s1241_s17   ;;  %s1740_s15 = smov %s1237_s16 }
  0x93   : > { %p11_p5 = scmp.ge.s32.totalorder %s14_s17, 4   ;;  %s1741_s16 = smov %s1743_s18 }
  0x95   :  { %13 = sbr.rel (!%p11_p5) target bundleno = 2 (0x2), region = 75 }

</bundles_post_ra>
